<compile_context>
chip_gen: v7x
topology: tpu7x:2x2x1
jax: 0.10.0
libtpu: 0.0.40
codegen_flags: <defaults>
</compile_context>

<pallas_src>
import functools

import jax
import jax.numpy as jnp
from jax import lax
from jax.experimental import pallas as pl
from jax.experimental.pallas import tpu as pltpu


def _fit_tile(dim, target, align):
    """Largest multiple of `align` that divides `dim` and is <= `target`.

    Falls back to the full dim (a full-extent block is always a legal
    BlockSpec), so the Mosaic (8, 128) tiling rule is never violated.
    """
    if dim <= target:
        return dim
    t = (target // align) * align
    while t >= align:
        if dim % t == 0:
            return t
        t -= align
    return dim


# ---------------------------------------------------------------------------
# Tiled linear (x @ w + b) kernel
# ---------------------------------------------------------------------------
def _linear_kernel(x_ref, w_ref, b_ref, o_ref, acc_ref, *, mxu_dtype):
    @pl.when(pl.program_id(2) == 0)
    def _():
        acc_ref[...] = jnp.zeros(acc_ref.shape, jnp.float32)

    x = x_ref[...]
    w = w_ref[...]
    if mxu_dtype is not None:           # bf16 MXU fast path (v6e/v7x)
        x = x.astype(mxu_dtype)
        w = w.astype(mxu_dtype)
    acc_ref[...] += jnp.dot(x, w, preferred_element_type=jnp.float32)

    @pl.when(pl.program_id(2) == pl.num_programs(2) - 1)
    def _():
        o_ref[...] = (acc_ref[...] + b_ref[...].astype(jnp.float32)).astype(o_ref.dtype)


def linear(x, w, b, tm=512, tn=512, tk=512, mxu_dtype=None):
    """x: (M, K), w: (K, N), b: (N,) -> (M, N). Tiled + pipelined Pallas matmul."""
    M, K = x.shape
    _, N = w.shape
    tm = _fit_tile(M, tm, 8)        # sublane dim of x / out
    tn = _fit_tile(N, tn, 128)      # lane dim of w / out
    tk = _fit_tile(K, tk, 128)      # lane dim of x, sublane dim of w
    grid = (M // tm, N // tn, K // tk)
    itemsize = x.dtype.itemsize
    # double-buffered in/out blocks + f32 accumulator, with 2x headroom
    vmem_needed = 2 * itemsize * (tm * tk + tk * tn + tn + tm * tn) + 4 * tm * tn
    vmem_limit = int(min(100 << 20, max(32 << 20, 2 * vmem_needed)))
    return pl.pallas_call(
        functools.partial(_linear_kernel, mxu_dtype=mxu_dtype),
        out_shape=jax.ShapeDtypeStruct((M, N), x.dtype),
        grid_spec=pltpu.PrefetchScalarGridSpec(
            num_scalar_prefetch=0,
            grid=grid,
            in_specs=[
                pl.BlockSpec((tm, tk), lambda i, j, k: (i, k)),
                pl.BlockSpec((tk, tn), lambda i, j, k: (k, j)),
                pl.BlockSpec((1, tn), lambda i, j, k: (0, j)),
            ],
            out_specs=pl.BlockSpec((tm, tn), lambda i, j, k: (i, j)),
            scratch_shapes=[pltpu.VMEM((tm, tn), jnp.float32)],
        ),
        compiler_params=pltpu.CompilerParams(
            dimension_semantics=("parallel", "parallel", "arbitrary"),
            vmem_limit_bytes=vmem_limit),
        cost_estimate=pl.CostEstimate(
            flops=int(2 * M * N * K),
            transcendentals=0,
            bytes_accessed=int(itemsize * (M * K + K * N + M * N + N))),
    )(x, w, b.reshape(1, N))


# ---------------------------------------------------------------------------
# Fused multi-head flash attention kernel (online softmax, causal skipping,
# head layout fused into the BlockSpecs, lane-dense output)
# ---------------------------------------------------------------------------
def _flash_kernel(q_ref, k_ref, v_ref, o_ref, m_ref, l_ref, acc_ref,
                  *, scale, causal, n_heads, d_head, tq, tk, mxu_dtype):
    qi = pl.program_id(1)
    kv = pl.program_id(2)
    nkv = pl.num_programs(2)
    h = d_head

    @pl.when(kv == 0)
    def _():
        m_ref[...] = jnp.full(m_ref.shape, -jnp.inf, jnp.float32)
        l_ref[...] = jnp.zeros(l_ref.shape, jnp.float32)
        acc_ref[...] = jnp.zeros(acc_ref.shape, jnp.float32)

    def update(masked):
        if masked:
            # diagonal block (kv == qi, tq == tk): global row >= global col
            # reduces to in-block row >= col -> no program_id arithmetic.
            row = lax.broadcasted_iota(jnp.int32, (tq, tk), 0)
            col = lax.broadcasted_iota(jnp.int32, (tq, tk), 1)
            keep = row >= col
        for hi in range(n_heads):               # static unroll over heads
            cs = slice(hi * h, (hi + 1) * h)
            # fold the softmax scale into the (tq, h) q tile, not the scores
            q = q_ref[0, :, cs] * scale
            k = k_ref[0, :, cs]
            v = v_ref[0, :, cs]
            if mxu_dtype is not None:           # bf16 MXU operands (v6e/v7x)
                q = q.astype(mxu_dtype)
                k = k.astype(mxu_dtype)
                v = v.astype(mxu_dtype)
            # contract the head dim directly (no K transpose), f32 accumulate
            s = lax.dot_general(q, k, (((1,), (1,)), ((), ())),
                                preferred_element_type=jnp.float32)  # (tq, tk)
            if masked:
                s = jnp.where(keep, s, -1e30)
            m_prev = m_ref[:, hi:hi + 1]                               # (tq, 1)
            m_new = jnp.maximum(m_prev, jnp.max(s, axis=-1, keepdims=True))
            alpha = jnp.exp(m_prev - m_new)
            p = jnp.exp(s - m_new)                                     # f32 softmax
            l_ref[:, hi:hi + 1] = alpha * l_ref[:, hi:hi + 1] + jnp.sum(
                p, axis=-1, keepdims=True)
            pv = jnp.dot(p.astype(v.dtype), v, preferred_element_type=jnp.float32)
            acc_ref[:, cs] = alpha * acc_ref[:, cs] + pv
            m_ref[:, hi:hi + 1] = m_new

    if causal:
        pl.when(kv == qi)(lambda: update(True))    # diagonal block: masked
        pl.when(kv < qi)(lambda: update(False))    # strictly lower: no mask
        # kv > qi blocks: fully masked -> skipped (DMA elided via clamped map)
    else:
        update(False)

    @pl.when(kv == nkv - 1)
    def _():
        for hi in range(n_heads):
            cs = slice(hi * h, (hi + 1) * h)
            inv = pl.reciprocal(l_ref[:, hi:hi + 1], approx=True)
            o_ref[0, :, cs] = (acc_ref[:, cs] * inv).astype(o_ref.dtype)


def flash_attention(q, k, v, n_heads, d_head, scale, causal=True, block=256,
                    mxu_dtype=None):
    """q, k, v, out: (b, L, n_heads*d_head); head ni occupies channels
    [ni*d_head, (ni+1)*d_head). Multi-head flash attention with the head
    split/merge fused into the BlockSpecs (no transposes) and a lane-dense
    (n*h wide) output block."""
    b, L, d = q.shape
    assert d == n_heads * d_head
    itemsize = q.dtype.itemsize
    # keep each (tq, d) block <= ~2 MiB so the double-buffered q/k/v/o working
    # set stays well inside scoped VMEM on every generation (incl. v7x 64 MiB)
    while block > 128 and block * d * itemsize > (2 << 20):
        block //= 2
    tq = _fit_tile(L, block, 8)
    tk = tq                       # equal tiles keep the diagonal mask index-free
    nq, nkv = L // tq, L // tk

    def q_map(bi, qi, kv):
        return (bi, qi, 0)

    def kv_map(bi, qi, kv):
        if causal:
            kv = jnp.minimum(kv, qi)   # don't fetch fully-masked kv blocks
        return (bi, kv, 0)

    kernel = functools.partial(
        _flash_kernel, scale=scale, causal=causal, n_heads=n_heads,
        d_head=d_head, tq=tq, tk=tk, mxu_dtype=mxu_dtype)

    flops = 4 * b * n_heads * L * L * d_head
    exps = b * n_heads * L * L
    kv_reads = b * L * d * nq                    # k/v re-read once per q block
    if causal:
        flops //= 2
        exps //= 2
        kv_reads = (kv_reads + b * L * d) // 2
    vmem_needed = 2 * itemsize * 4 * tq * d + 4 * (tq * d + 2 * tq * n_heads)
    vmem_limit = int(min(100 << 20, max(32 << 20, 2 * vmem_needed)))

    return pl.pallas_call(
        kernel,
        out_shape=jax.ShapeDtypeStruct((b, L, d), q.dtype),
        grid_spec=pltpu.PrefetchScalarGridSpec(
            num_scalar_prefetch=0,
            grid=(b, nq, nkv),
            in_specs=[
                pl.BlockSpec((1, tq, d), q_map),
                pl.BlockSpec((1, tk, d), kv_map),
                pl.BlockSpec((1, tk, d), kv_map),
            ],
            out_specs=pl.BlockSpec((1, tq, d), q_map),
            scratch_shapes=[
                pltpu.VMEM((tq, n_heads), jnp.float32),   # running max m (per head)
                pltpu.VMEM((tq, n_heads), jnp.float32),   # running sum l (per head)
                pltpu.VMEM((tq, d), jnp.float32),         # output accumulator
            ],
        ),
        compiler_params=pltpu.CompilerParams(
            dimension_semantics=("parallel", "parallel", "arbitrary"),
            vmem_limit_bytes=vmem_limit),
        cost_estimate=pl.CostEstimate(
            flops=int(flops),
            transcendentals=int(exps),
            bytes_accessed=int(itemsize * 2 * b * L * d + 2 * itemsize * kv_reads)),
    )(q, k, v)


# ---------------------------------------------------------------------------
# RoPE (matches RotaryEmbedding: interleaved pairs, theta=10000).
# Applied on the (b, L, n, h) view (a free reshape of (b, L, n*h) -- no
# transpose).  TODO(synk): fuse RoPE into the attention kernel.
# ---------------------------------------------------------------------------
def rope(x, theta=10000.0):
    b, L, n, h = x.shape
    freqs = theta ** (-jnp.arange(0, h, 2, dtype=jnp.float32) / h)       # (h/2,)
    ang = jnp.arange(L, dtype=jnp.float32)[:, None] * freqs[None, :]     # (L, h/2)
    cos = jnp.cos(ang)[None, :, None, :]
    sin = jnp.sin(ang)[None, :, None, :]
    xr = x.reshape(b, L, n, h // 2, 2)
    x0, x1 = xr[..., 0], xr[..., 1]
    o0 = cos * x0 - sin * x1
    o1 = sin * x0 + cos * x1
    return jnp.stack([o0, o1], axis=-1).reshape(b, L, n, h)


# ---------------------------------------------------------------------------
# Full Attention.forward
# ---------------------------------------------------------------------------
def attention_forward(x, params, n_heads, d_head, causal=True, attn_block=256,
                      mxu_dtype=None):
    b, L, d_model = x.shape
    d = n_heads * d_head

    # QKV projection (tiled Pallas matmul)
    qkv = linear(x.reshape(b * L, d_model), params["Wqkv"], params["bqkv"],
                 mxu_dtype=mxu_dtype)
    qkv = qkv.reshape(b, L, 3 * d)
    q, k, v = jnp.split(qkv, 3, axis=-1)   # (b, L, d) each, heads contiguous

    # rotary embedding on q, k (per head; (b, L, n, h) view is a free reshape)
    q = rope(q.reshape(b, L, n_heads, d_head)).reshape(b, L, d)
    k = rope(k.reshape(b, L, n_heads, d_head)).reshape(b, L, d)

    # fused multi-head flash attention: no head transposes in or out
    o = flash_attention(q, k, v, n_heads, d_head, scale=d_head ** -0.5,
                        causal=causal, block=attn_block, mxu_dtype=mxu_dtype)

    # output projection (tiled Pallas matmul); reshape is free (no transpose)
    out = linear(o.reshape(b * L, d), params["Wo"], params["bo"],
                 mxu_dtype=mxu_dtype)
    return out.reshape(b, L, d_model)


# ---------------------------------------------------------------------------
# Pure-JAX reference (for correctness check of the Pallas kernels)
# ---------------------------------------------------------------------------
def reference_forward(x, params, n_heads, d_head, causal=True):
    b, L, d_model = x.shape
    d = n_heads * d_head
    qkv = x @ params["Wqkv"] + params["bqkv"]
    q, k, v = jnp.split(qkv, 3, axis=-1)
    q = rope(q.reshape(b, L, n_heads, d_head))
    k = rope(k.reshape(b, L, n_heads, d_head))
    v = v.reshape(b, L, n_heads, d_head)
    q, k, v = (t.transpose(0, 2, 1, 3) for t in (q, k, v))
    s = jnp.einsum("bnqh,bnkh->bnqk", q, k) * (d_head ** -0.5)
    if causal:
        mask = jnp.tril(jnp.ones((L, L), bool))
        s = jnp.where(mask, s, -1e30)
    p = jax.nn.softmax(s, axis=-1)
    o = jnp.einsum("bnqk,bnkh->bnqh", p, v)
    o = o.transpose(0, 2, 1, 3).reshape(b, L, d)
    return o @ params["Wo"] + params["bo"]


# ---------------------------------------------------------------------------
# Deterministic parameter init (shapes per Attention.__init__)
# ---------------------------------------------------------------------------
def init_params(key, d_model, n_heads, d_head):
    d = n_heads * d_head
    k1, k2, k3, k4 = jax.random.split(key, 4)
    return {
        "Wqkv": 0.05 * jax.random.normal(k1, (d_model, 3 * d), jnp.float32),
        "bqkv": 0.05 * jax.random.normal(k2, (3 * d,), jnp.float32),
        "Wo":   0.05 * jax.random.normal(k3, (d, d_model), jnp.float32),
        "bo":   0.05 * jax.random.normal(k4, (d_model,), jnp.float32),
    }


if __name__ == "__main__":
    # small config: d_model=32, n_heads=4 -> d_head=8, batch=2, seq=16
    d_model, n_heads = 32, 4
    d_head = d_model // n_heads
    b, L = 2, 16

    key = jax.random.PRNGKey(0)
    pkey, xkey = jax.random.split(key)
    params = init_params(pkey, d_model, n_heads, d_head)
    x = jax.random.normal(xkey, (b, L, d_model), jnp.float32)

    ref = reference_forward(x, params, n_heads, d_head, causal=True)

    # 1) default tiles (single kv block at this tiny L)
    out = attention_forward(x, params, n_heads, d_head, causal=True)
    out = jax.block_until_ready(out)
    assert out.shape == (b, L, d_model)
    err = float(jnp.max(jnp.abs(out - ref)))
    assert jnp.allclose(out, ref, atol=2e-2, rtol=2e-2), f"max abs err {err}"

    # 2) small attention tiles to exercise the multi-block causal path
    #    (diagonal mask, unmasked lower blocks, skipped/clamped upper blocks)
    out2 = attention_forward(x, params, n_heads, d_head, causal=True,
                             attn_block=8)
    out2 = jax.block_until_ready(out2)
    err2 = float(jnp.max(jnp.abs(out2 - ref)))
    assert jnp.allclose(out2, ref, atol=2e-2, rtol=2e-2), f"max abs err {err2}"

    print("KERNEL_OK")
</pallas_src>

<mosaic_0001>
module attributes {stable_mosaic.version = 11 : i64} {
  func.func @_linear_kernel(%arg0: i32, %arg1: i32, %arg2: i32, %arg3: memref<32x32xf32, #tpu.memory_space<vmem>>, %arg4: memref<32x96xf32, #tpu.memory_space<vmem>>, %arg5: memref<1x96xf32, #tpu.memory_space<vmem>>, %arg6: memref<32x96xf32, #tpu.memory_space<vmem>>, %arg7: memref<32x96xf32, #tpu.memory_space<vmem>>) attributes {dimension_semantics = [#tpu.dimension_semantics<parallel>, #tpu.dimension_semantics<parallel>, #tpu.dimension_semantics<arbitrary>], iteration_bounds = array<i64: 1, 1, 1>, scalar_prefetch = 0 : i64, scratch_operands = 1 : i64, tpu.core_type = #tpu.core_type<tc>, window_params = [{transform_indices = @transform_0, window_bounds = array<i64: 32, 32>}, {transform_indices = @transform_1, window_bounds = array<i64: 32, 96>}, {transform_indices = @transform_2, window_bounds = array<i64: 1, 96>}, {transform_indices = @transform_3, window_bounds = array<i64: 32, 96>}]} {
    %c0_i32 = arith.constant 0 : i32
    %0 = arith.cmpi eq, %arg2, %c0_i32 : i32
    %1 = arith.extui %0 : i1 to i32
    %c0_i32_0 = arith.constant 0 : i32
    %2 = arith.cmpi ne, %1, %c0_i32_0 : i32
    scf.if %2 {
      %cst_10 = arith.constant 0.000000e+00 : f32
      %12 = vector.broadcast %cst_10 : f32 to vector<32x96xf32>
      %c0_11 = arith.constant 0 : index
      %c0_12 = arith.constant 0 : index
      %13 = vector.load %arg7[%c0_11, %c0_12] : memref<32x96xf32, #tpu.memory_space<vmem>>, vector<32x96xf32>
      tpu.vector_store %arg7[%c0_11, %c0_12], %12 {strides = array<i32>} : memref<32x96xf32, #tpu.memory_space<vmem>>, vector<32x96xf32>,
    } else {
    }
    %c0 = arith.constant 0 : index
    %c0_1 = arith.constant 0 : index
    %3 = vector.load %arg3[%c0, %c0_1] : memref<32x32xf32, #tpu.memory_space<vmem>>, vector<32x32xf32>
    %c0_2 = arith.constant 0 : index
    %c0_3 = arith.constant 0 : index
    %4 = vector.load %arg4[%c0_2, %c0_3] : memref<32x96xf32, #tpu.memory_space<vmem>>, vector<32x96xf32>
    %c0_4 = arith.constant 0 : index
    %c0_5 = arith.constant 0 : index
    %5 = vector.load %arg7[%c0_4, %c0_5] : memref<32x96xf32, #tpu.memory_space<vmem>>, vector<32x96xf32>
    %cst = arith.constant dense<0.000000e+00> : vector<32x96xf32>
    %6 = tpu.matmul %3, %4, %cst {dimension_numbers = #tpu.dot_dimension_numbers<[1], [0], [0], [1], [0, 0, 1, 1], [], []>} : vector<32x32xf32>, vector<32x96xf32>, vector<32x96xf32> -> vector<32x96xf32>
    %7 = arith.addf %5, %6 : vector<32x96xf32>
    %c0_6 = arith.constant 0 : index
    %c0_7 = arith.constant 0 : index
    %8 = vector.load %arg7[%c0_6, %c0_7] : memref<32x96xf32, #tpu.memory_space<vmem>>, vector<32x96xf32>
    tpu.vector_store %arg7[%c0_6, %c0_7], %7 {strides = array<i32>} : memref<32x96xf32, #tpu.memory_space<vmem>>, vector<32x96xf32>,
    %c0_i32_8 = arith.constant 0 : i32
    %9 = arith.cmpi eq, %arg2, %c0_i32_8 : i32
    %10 = arith.extui %9 : i1 to i32
    %c0_i32_9 = arith.constant 0 : i32
    %11 = arith.cmpi ne, %10, %c0_i32_9 : i32
    scf.if %11 {
      %c0_10 = arith.constant 0 : index
      %c0_11 = arith.constant 0 : index
      %12 = vector.load %arg7[%c0_10, %c0_11] : memref<32x96xf32, #tpu.memory_space<vmem>>, vector<32x96xf32>
      %c0_12 = arith.constant 0 : index
      %c0_13 = arith.constant 0 : index
      %13 = vector.load %arg5[%c0_12, %c0_13] : memref<1x96xf32, #tpu.memory_space<vmem>>, vector<1x96xf32>
      %14 = vector.broadcast %13 : vector<1x96xf32> to vector<32x96xf32>
      %15 = arith.addf %12, %14 : vector<32x96xf32>
      %c0_14 = arith.constant 0 : index
      %c0_15 = arith.constant 0 : index
      %16 = vector.load %arg6[%c0_14, %c0_15] : memref<32x96xf32, #tpu.memory_space<vmem>>, vector<32x96xf32>
      tpu.vector_store %arg6[%c0_14, %c0_15], %15 {strides = array<i32>} : memref<32x96xf32, #tpu.memory_space<vmem>>, vector<32x96xf32>,
    } else {
    }
    return
  }
  func.func @transform_0(%arg0: i32, %arg1: i32, %arg2: i32) -> (i32, i32) {
    %c0_i32 = arith.constant 0 : i32
    return %arg0, %arg2 : i32, i32
  }
  func.func @transform_1(%arg0: i32, %arg1: i32, %arg2: i32) -> (i32, i32) {
    %c0_i32 = arith.constant 0 : i32
    return %arg2, %arg1 : i32, i32
  }
  func.func @transform_2(%arg0: i32, %arg1: i32, %arg2: i32) -> (i32, i32) {
    %c0_i32 = arith.constant 0 : i32
    %c0_i32_0 = arith.constant 0 : i32
    return %c0_i32, %arg1 : i32, i32
  }
  func.func @transform_3(%arg0: i32, %arg1: i32, %arg2: i32) -> (i32, i32) {
    %c0_i32 = arith.constant 0 : i32
    return %arg0, %arg1 : i32, i32
  }
}

</mosaic_0001>

<bundles_post_ra>
// kernel: tpu_custom_call.1
= control target key start
LH: loop header
LB: loop body
LE: loop exit
PB: predicated region body
PF: predicated region fallthrough
CT: control target
= control target key end

     0   :  { %8 = vsyncpa [#allocation4], 0  ;;  %s418_s0 = inlined_call_operand.hbm [shape: f32[32,32], index: 0, kind: input, shape index: {}]   ;;  %s419_s1 = inlined_call_operand.hbm [shape: f32[32,96], index: 1, kind: input, shape index: {}]   ;;  %s420_s2 = inlined_call_operand.vmem [shape: f32[1,96], index: 2, kind: input, shape index: {}]   ;;  %s421_s3 = inlined_call_operand.hbm [shape: f32[32,96], index: 3, kind: output, shape index: {}]  }
   0x1   :  { %9 = vsyncpa [#allocation7], 0 }
   0x2   :  { %10 = vsyncpa [#allocation5], 0  ;;  %s328_s12 = smov [#allocation3]   ;;  %s256_s16 = scalar_lea.hbm %s418_s0, 512 }
   0x3   :  { %s16_s13 = sshll.u32 %s328_s12, 4  ;;  %p257_p0 = scmp.ne.s32.totalorder %s418_s0, %s256_s16  ;;  %s17_s13 = int_to_ptr.vmem [resolvable:$true] %s16_s13 }
   0x4   :  { %p260_p1 = scmp.lt.u32.totalorder %s256_s16, %s418_s0 }
   0x6   :  { %p262_p2 = pnand %p260_p1, %p257_p0 }
   0x8   :  { %265 = shalt.err (!%p262_p2)
}
   0x9   :  { %s266_s21 = scalar_lea.vmem %s17_s13, 512  ;;  %p271_p4 = scmp.lt.s32.totalorder %s17_s13, %s17_s13 }
   0xa   :  { %p267_p3 = scmp.ne.s32.totalorder %s17_s13, %s266_s21  ;;  %p272_p5 = scmp.lt.s32.totalorder %s266_s21, %s266_s21 }
   0xc   :  { %p273_p6 = por %p272_p5, %p271_p4 }
   0xe   :  { %p274_p7 = pnand %p273_p6, %p267_p3 }
  0x10   :  { %277 = shalt.err (!%p274_p7)
}
  0x11   :  { %s329_s22 = smov 128   ;;  %s330_s23 = smov 8  }
  0x12   :  { %22 = dma.hbm_to_vmem [thread:$0]  %s418_s0, 512, %s17_s13, [#allocation4], %s329_s22, %s329_s22, %s330_s23  }
  0x13   :  { %s331_s26 = smov [#allocation6]   ;;  %s278_s30 = scalar_lea.hbm %s419_s1, 512 }
  0x14   :  { %s28_s27 = sshll.u32 %s331_s26, 4  ;;  %p279_p8 = scmp.ne.s32.totalorder %s419_s1, %s278_s30  ;;  %s29_s27 = int_to_ptr.vmem [resolvable:$true] %s28_s27 }
  0x15   :  { %p282_p9 = scmp.lt.u32.totalorder %s278_s30, %s419_s1 }
  0x17   :  { %p284_p10 = pnand %p282_p9, %p279_p8 }
  0x19   :  { %287 = shalt.err (!%p284_p10)
}
  0x1a   :  { %s288_s8 = scalar_lea.vmem %s29_s27, 512  ;;  %p293_p12 = scmp.lt.s32.totalorder %s29_s27, %s29_s27 }
  0x1b   :  { %p289_p11 = scmp.ne.s32.totalorder %s29_s27, %s288_s8  ;;  %p294_p13 = scmp.lt.s32.totalorder %s288_s8, %s288_s8 }
  0x1d   :  { %p295_p0 = por %p294_p13, %p293_p12 }
  0x1f   :  { %p296_p1 = pnand %p295_p0, %p289_p11 }
  0x21   :  { %299 = shalt.err (!%p296_p1)
}
  0x22   :  { %34 = dma.hbm_to_vmem [thread:$0]  %s419_s1, 512, %s29_s27, [#allocation7], %s329_s22, %s329_s22, %s330_s23  }
  0x23   :  { %322 = dma.done.wait [#allocation4], 512  }
  0x24   :  { %323 = vsyncadd [#allocation4], 4294966784 }
  0x25   :  { %324 = dma.done.wait [#allocation7], 512  }
  0x26   :  { %325 = vsyncadd [#allocation7], 4294966784  ;;  %vm47_vm0 = vcmask 785408   ;;  %v332_v0 = vmov 0.0   ;;  %vm64_vm1 = vcmask 261120   ;;  %v56_v1 = vld [vmem:[#allocation6] sm:$0xff] }
  0x27   :  { %49 = vst.msk [vmem:[#allocation2 + $0x8] sm:$0xff] %vm47_vm0, %v332_v0  ;;  %48 = vst.msk [vmem:[#allocation2] sm:$0xff] %vm47_vm0, %v332_v0  ;;  %v57_v2 = vld [vmem:[#allocation6 + $0x8] sm:$0xff]  ;;  %v58_v3 = vld [vmem:[#allocation6 + $0x10] sm:$0xff]  ;;  %s333_s11 = smov [#allocation8]  }
  0x28   :  { %50 = vst.msk [vmem:[#allocation2 + $0x10] sm:$0xff] %vm47_vm0, %v332_v0  ;;  %51 = vst.msk [vmem:[#allocation2 + $0x18] sm:$0xff] %vm47_vm0, %v332_v0  ;;  %v238_v4 = vpack.c.bf16 %v57_v2, %v56_v1  ;;  %v59_v5 = vld [vmem:[#allocation6 + $0x18] sm:$0xff]  ;;  %v52_v6 = vld [vmem:[#allocation3] sm:$0xff]  ;;  %s198_s12 = sshll.u32 %s333_s11, 4  ;;  %s199_s12 = int_to_ptr.vmem [resolvable:$true] %s198_s12 }
  0x29   :  { %v54_v7 = vld [vmem:[#allocation3 + $0x10] sm:$0xff]  ;;  %v242_v8 = vpack.c.bf16 %v59_v5, %v58_v3  ;;  %232 = vmatprep.mubr.msk.f32.mxu0 %vm64_vm1, %v52_v6  ;;  %v53_v9 = vld [vmem:[#allocation3 + $0x8] sm:$0xff]  ;;  %v55_v10 = vld [vmem:[#allocation3 + $0x18] sm:$0xff]  ;;  %p305_p3 = scmp.lt.s32.totalorder %s199_s12, %s199_s12 }
  0x2a   :  { %235 = vmatprep.mubr.msk.f32.mxu1 %vm64_vm1, %v54_v7  ;;  %239 = vmatprep.subr.bf16.mxu0 %v238_v4  ;;  %v215_v23 = vld [vmem:[%s420_s2] ss:$0 sm:$0xff]  ;;  %s300_s2 = scalar_lea.vmem %s199_s12, 512 }
  0x2b   :  { %246 = vmatprep.subr.bf16.mxu1 %v238_v4  ;;  %241 = vmatpush3.bf16.msra.mxu0 %v238_v4  ;;  %p301_p2 = scmp.ne.s32.totalorder %s199_s12, %s300_s2  ;;  %p306_p4 = scmp.lt.s32.totalorder %s300_s2, %s300_s2 }
  0x2c   :  { %248 = vmatpush3.bf16.msra.mxu1 %v238_v4  ;;  %243 = vmatprep.subr.bf16.mxu0 %v242_v8 }
  0x2d   :  { %247 = vmatprep.subr.bf16.mxu1 %v242_v8  ;;  %p307_p5 = por %p306_p4, %p305_p3 }
  0x2e   :  { %v61_v11 = vld [vmem:[#allocation2 + $0x8] sm:$0xff]  ;;  %v60_v13 = vld [vmem:[#allocation2] sm:$0xff] }
  0x2f   :  { %245 = vmatpush3.bf16.msra.mxu0 %v242_v8  ;;  %v63_v12 = vld [vmem:[#allocation2 + $0x18] sm:$0xff]  ;;  %v62_v14 = vld [vmem:[#allocation2 + $0x10] sm:$0xff]  ;;  %p308_p6 = pnand %p307_p5, %p301_p2 }
  0x30   :  { %249 = vmatpush3.bf16.msra.mxu1 %v242_v8 }
  0x32   :  { %233 = vmatmul.mubr.msk.f32.vlgmr.msra.gmra.mrb[0].mxu0 %vm64_vm1, %v53_v9 }
  0x33   :  { %236 = vmatmul.mubr.msk.f32.vlgmr.msra.gmra.mrb[0].mxu1 %vm64_vm1, %v55_v10 }
 0x105   :  { %v234_v15 = vpop.f32.mrb[0].mxu0 }
 0x106   :  { %v237_v16 = vpop.f32.mrb[0].mxu1  ;;  %v163_v17 = vadd.f32 %v234_v15, %v61_v11  ;;  %v143_v19 = vpop.f32.mrb[1].mxu0 }
 0x107   :  { %v165_v18 = vadd.f32 %v237_v16, %v63_v12  ;;  %v153_v20 = vpop.f32.mrb[1].mxu1  ;;  %v162_v21 = vadd.f32 %v143_v19, %v60_v13 }
 0x108   :  { %v164_v22 = vadd.f32 %v153_v20, %v62_v14  ;;  %168 = vst.msk [vmem:[#allocation2 + $0x8] sm:$0xff] %vm47_vm0, %v163_v17 }
 0x109   :  { %170 = vst.msk [vmem:[#allocation2 + $0x18] sm:$0xff] %vm47_vm0, %v165_v18  ;;  %167 = vst.msk [vmem:[#allocation2] sm:$0xff] %vm47_vm0, %v162_v21 }
 0x10a   :  { %169 = vst.msk [vmem:[#allocation2 + $0x10] sm:$0xff] %vm47_vm0, %v164_v22 }
 0x10f   :  { %v175_v24 = vld [vmem:[#allocation2 + $0x8] sm:$0xff] }
 0x110   :  { %v177_v25 = vld [vmem:[#allocation2 + $0x18] sm:$0xff]  ;;  %v174_v26 = vld [vmem:[#allocation2] sm:$0xff]  ;;  %v186_v28 = vadd.f32 %v215_v23, %v175_v24 }
 0x111   :  { %v176_v27 = vld [vmem:[#allocation2 + $0x10] sm:$0xff]  ;;  %v188_v29 = vadd.f32 %v215_v23, %v177_v25  ;;  %v185_v30 = vadd.f32 %v215_v23, %v174_v26 }
 0x112   :  { %v187_v31 = vadd.f32 %v215_v23, %v176_v27  ;;  %190 = vst.msk [vmem:[#allocation8 + $0x8] sm:$0xff] %vm47_vm0, %v186_v28 }
 0x113   :  { %192 = vst.msk [vmem:[#allocation8 + $0x18] sm:$0xff] %vm47_vm0, %v188_v29  ;;  %189 = vst.msk [vmem:[#allocation8] sm:$0xff] %vm47_vm0, %v185_v30 }
 0x114   :  { %191 = vst.msk [vmem:[#allocation8 + $0x10] sm:$0xff] %vm47_vm0, %v187_v31 }
 0x115   :  { %311 = shalt.err (!%p308_p6)
}
 0x116   :  { %s312_s15 = scalar_lea.hbm %s421_s3, 512 }
 0x117   :  { %p313_p7 = scmp.ne.s32.totalorder %s421_s3, %s312_s15  ;;  %p316_p8 = scmp.lt.u32.totalorder %s312_s15, %s421_s3 }
 0x119   :  { %p318_p9 = pnand %p316_p8, %p313_p7 }
 0x11b   :  { %321 = shalt.err (!%p318_p9)
}
 0x11c   :  { %204 = dma.vmem_to_hbm [thread:$0]  %s199_s12, 512, %s421_s3, [#allocation5], %s329_s22, %s329_s22, %s330_s23  }
 0x11d   :  { %326 = dma.done.wait [#allocation5], 512  }
 0x11e   :  { %327 = vsyncadd [#allocation5], 4294966784 }
 0x11f   :  { %208 = vsyncpa [#allocation4], 1 }
 0x120   :  { %209 = vsyncpa [#allocation7], 1 }
 0x121   :  { %210 = vsyncpa [#allocation5], 1 }

</bundles_post_ra>
